<compile_context>
chip_gen: v5e
topology: v5e:2x2
jax: 0.10.0
libtpu: 0.0.40
codegen_flags: <defaults>
</compile_context>

<pallas_src>
import functools
import math

import jax
import jax.numpy as jnp
from jax import lax
from jax.experimental import pallas as pl
from jax.experimental.pallas import tpu as pltpu


def _embed_add_kernel(ids_ref, emb_ref, pos_ref, out_ref, rows_ref):
    # ids_ref : (B*S,) int32 in SMEM  -- scalar-prefetched token ids, flattened row-major
    # emb_ref : (V, Dp)               -- full embedding table, VMEM-resident (single buffer)
    # pos_ref : (T, Dp)               -- positional-encoding rows for this sequence tile
    # out_ref : (1, T, Dp)
    # rows_ref: (T, Dp)               -- VMEM scratch for the gathered rows
    s = pl.program_id(0)
    b = pl.program_id(1)
    t_tile = rows_ref.shape[0]
    v = emb_ref.shape[0]
    base = (b * pl.num_programs(0) + s) * t_tile  # flat offset of this tile's first token id

    def gather_row(t, carry):
        tok = ids_ref[base + t]
        tok = jnp.clip(tok, 0, v - 1)             # avoid OOB VMEM reads (no HW bounds check)
        rows_ref[pl.ds(t, 1), :] = emb_ref[pl.ds(tok, 1), :]
        return carry

    lax.fori_loop(0, t_tile, gather_row, 0)

    rows = rows_ref[...].astype(jnp.float32)
    out_ref[0] = (rows + pos_ref[...].astype(jnp.float32)).astype(out_ref.dtype)


@functools.lru_cache(maxsize=1)
def _vmem_capacity_bytes() -> int:
    try:
        return int(pltpu.get_tpu_info().vmem_capacity_bytes)
    except Exception:
        return 64 * 1024 * 1024  # conservative: v7x per-TC VMEM


def _round_up(x: int, m: int) -> int:
    return (x + m - 1) // m * m


@jax.jit
def input_embedding_forward(token_ids, emb_table, pos_table):
    """token_ids [B,S] int, emb_table [V,D], pos_table [S,D]  ->  [B,S,D]."""
    B, S = token_ids.shape
    V, D = emb_table.shape
    assert pos_table.shape == (S, D)

    out_dtype = jnp.result_type(emb_table.dtype, pos_table.dtype)

    # Lane-dense stores: pad the model dim to a multiple of 128, slice back at the end.
    Dp = _round_up(D, 128)
    if Dp != D:
        emb_table = jnp.pad(emb_table, ((0, 0), (0, Dp - D)))
        pos_table = jnp.pad(pos_table, ((0, 0), (0, Dp - D)))

    emb_isz = jnp.dtype(emb_table.dtype).itemsize
    pos_isz = jnp.dtype(pos_table.dtype).itemsize
    out_isz = jnp.dtype(out_dtype).itemsize
    table_bytes = V * Dp * emb_isz

    def tile_working_set(t):
        # pos tile + out tile are double-buffered by the pipeline; gather scratch is single.
        return t * Dp * (2 * pos_isz + 2 * out_isz + emb_isz)

    headroom = 8 * 1024 * 1024
    budget = _vmem_capacity_bytes() - headroom

    # Sequence tile: largest multiple-of-128 tile dividing S that fits the VMEM budget,
    # else the full (short) sequence.
    T = S
    for cand in (2048, 1024, 512, 256, 128):
        if S % cand == 0 and table_bytes + tile_working_set(cand) <= budget:
            T = cand
            break
    assert table_bytes + tile_working_set(T) <= budget, (
        "embedding table does not fit in VMEM; large-vocab DMA-gather path not implemented")
    n_seq_tiles = S // T

    vmem_limit = int(min(budget,
                         max(32 * 1024 * 1024,
                             table_bytes + tile_working_set(T) + (4 << 20))))

    ids_flat = token_ids.astype(jnp.int32).reshape(B * S)

    out = pl.pallas_call(
        _embed_add_kernel,
        out_shape=jax.ShapeDtypeStruct((B, S, Dp), out_dtype),
        grid_spec=pltpu.PrefetchScalarGridSpec(
            num_scalar_prefetch=1,
            grid=(n_seq_tiles, B),              # seq-tile outer: pos tile reused across batch
            in_specs=[
                # Whole table resident in VMEM, no pipelining => single buffer, DMA'd once.
                pl.BlockSpec(memory_space=pltpu.MemorySpace.VMEM),
                pl.BlockSpec((T, Dp), lambda s, b, ids: (s, 0)),
            ],
            out_specs=pl.BlockSpec((1, T, Dp), lambda s, b, ids: (b, s, 0)),
            scratch_shapes=[pltpu.VMEM((T, Dp), emb_table.dtype)],
        ),
        compiler_params=pltpu.CompilerParams(
            dimension_semantics=("parallel", "parallel"),
            vmem_limit_bytes=vmem_limit,
        ),
    )(ids_flat, emb_table, pos_table)

    if Dp != D:
        out = out[:, :, :D]
    return out


def make_sinusoidal_pos_table(seq_len, d_model):
    """Standard transformer sinusoidal positional encoding, [S, D] float32."""
    pos = jnp.arange(seq_len, dtype=jnp.float32)[:, None]                  # [S, 1]
    i = jnp.arange(0, d_model, 2, dtype=jnp.float32)[None, :]              # [1, D/2]
    angle = pos / jnp.power(10000.0, i / d_model)                          # [S, D/2]
    pe = jnp.zeros((seq_len, d_model), dtype=jnp.float32)
    pe = pe.at[:, 0::2].set(jnp.sin(angle))
    pe = pe.at[:, 1::2].set(jnp.cos(angle))
    return pe


if __name__ == "__main__":
    # Small deterministic setup.
    B, S, D, V = 2, 8, 128, 32

    key = jax.random.PRNGKey(0)
    k_ids, k_emb = jax.random.split(key)

    token_ids = jax.random.randint(k_ids, (B, S), minval=0, maxval=V, dtype=jnp.int32)
    emb_table = (jax.random.normal(k_emb, (V, D), dtype=jnp.float32)
                 * (1.0 / math.sqrt(D)))
    pos_table = make_sinusoidal_pos_table(S, D)

    out = input_embedding_forward(token_ids, emb_table, pos_table)
    jax.block_until_ready(out)

    # Pure-JAX reference check.
    ref = emb_table[token_ids] + pos_table[None, :, :]
    assert out.shape == (B, S, D)
    assert out.dtype == jnp.float32
    max_err = float(jnp.max(jnp.abs(out - ref)))
    assert jnp.allclose(out, ref, atol=1e-3, rtol=1e-3), f"mismatch vs reference (max err {max_err})"

    print("KERNEL_OK")
</pallas_src>

<mosaic_0001>
module attributes {stable_mosaic.version = 11 : i64} {
  func.func @_embed_add_kernel(%arg0: i32, %arg1: i32, %arg2: memref<16xi32, #tpu.memory_space<smem>>, %arg3: memref<32x128xf32, #tpu.memory_space<vmem>>, %arg4: memref<8x128xf32, #tpu.memory_space<vmem>>, %arg5: memref<1x8x128xf32, #tpu.memory_space<vmem>>, %arg6: memref<8x128xf32, #tpu.memory_space<vmem>>) attributes {dimension_semantics = [#tpu.dimension_semantics<parallel>, #tpu.dimension_semantics<parallel>], iteration_bounds = array<i64: 1, 2>, scalar_prefetch = 1 : i64, scratch_operands = 1 : i64, tpu.core_type = #tpu.core_type<tc>, window_params = [{pipeline_mode = #tpu.pipeline_mode<synchronous>, transform_indices = @transform_0, window_bounds = array<i64: 32, 128>}, {transform_indices = @transform_1, window_bounds = array<i64: 8, 128>}, {transform_indices = @transform_2, window_bounds = array<i64: 1, 8, 128>}]} {
    %c1_i32 = arith.constant 1 : i32
    %0 = arith.muli %arg1, %c1_i32 : i32
    %1 = arith.addi %0, %arg0 : i32
    %c8_i32 = arith.constant 8 : i32
    %2 = arith.muli %1, %c8_i32 : i32
    %c0_i32 = arith.constant 0 : i32
    %c8_i32_0 = arith.constant 8 : i32
    %3 = arith.addi %c0_i32, %c8_i32_0 : i32
    %c1_i32_1 = arith.constant 1 : i32
    scf.for %arg7 = %c0_i32 to %3 step %c1_i32_1  : i32 {
      %10 = arith.addi %2, %arg7 : i32
      %11 = arith.index_cast %10 : i32 to index
      %12 = memref.load %arg2[%11] : memref<16xi32, #tpu.memory_space<smem>>
      %c0_i32_9 = arith.constant 0 : i32
      %c31_i32 = arith.constant 31 : i32
      %13 = arith.maxsi %c0_i32_9, %12 : i32
      %14 = arith.minsi %c31_i32, %13 : i32
      %15 = arith.index_cast %14 : i32 to index
      %c0_10 = arith.constant 0 : index
      %16 = vector.load %arg3[%15, %c0_10] : memref<32x128xf32, #tpu.memory_space<vmem>>, vector<1x128xf32>
      %17 = arith.index_cast %arg7 : i32 to index
      %c0_11 = arith.constant 0 : index
      %18 = vector.load %arg6[%17, %c0_11] : memref<8x128xf32, #tpu.memory_space<vmem>>, vector<1x128xf32>
      tpu.vector_store %arg6[%17, %c0_11], %16 {strides = array<i32>} : memref<8x128xf32, #tpu.memory_space<vmem>>, vector<1x128xf32>,
    }
    %c8_i32_2 = arith.constant 8 : i32
    %c0 = arith.constant 0 : index
    %c0_3 = arith.constant 0 : index
    %4 = vector.load %arg6[%c0, %c0_3] : memref<8x128xf32, #tpu.memory_space<vmem>>, vector<8x128xf32>
    %c0_4 = arith.constant 0 : index
    %c0_5 = arith.constant 0 : index
    %5 = vector.load %arg4[%c0_4, %c0_5] : memref<8x128xf32, #tpu.memory_space<vmem>>, vector<8x128xf32>
    %6 = arith.addf %4, %5 : vector<8x128xf32>
    %c0_6 = arith.constant 0 : index
    %c0_7 = arith.constant 0 : index
    %c0_8 = arith.constant 0 : index
    %7 = vector.load %arg5[%c0_6, %c0_7, %c0_8] : memref<1x8x128xf32, #tpu.memory_space<vmem>>, vector<1x8x128xf32>
    %8 = vector.shape_cast %7 : vector<1x8x128xf32> to vector<8x128xf32>
    %9 = vector.shape_cast %6 : vector<8x128xf32> to vector<1x8x128xf32>
    tpu.vector_store %arg5[%c0_6, %c0_7, %c0_8], %9 {strides = array<i32>} : memref<1x8x128xf32, #tpu.memory_space<vmem>>, vector<1x8x128xf32>,
    return
  }
  func.func @transform_0(%arg0: i32, %arg1: i32, %arg2: memref<16xi32, #tpu.memory_space<smem>>) -> (i32, i32) {
    %c0_i32 = arith.constant 0 : i32
    %c0_i32_0 = arith.constant 0 : i32
    %c0_i32_1 = arith.constant 0 : i32
    return %c0_i32, %c0_i32_0 : i32, i32
  }
  func.func @transform_1(%arg0: i32, %arg1: i32, %arg2: memref<16xi32, #tpu.memory_space<smem>>) -> (i32, i32) {
    %c0_i32 = arith.constant 0 : i32
    %c0_i32_0 = arith.constant 0 : i32
    return %arg0, %c0_i32 : i32, i32
  }
  func.func @transform_2(%arg0: i32, %arg1: i32, %arg2: memref<16xi32, #tpu.memory_space<smem>>) -> (i32, i32, i32) {
    %c0_i32 = arith.constant 0 : i32
    %c0_i32_0 = arith.constant 0 : i32
    return %arg1, %arg0, %c0_i32 : i32, i32, i32
  }
}

</mosaic_0001>

<bundles_post_ra>
// kernel: input_embedding_forward.1
= control target key start
LH: loop header
LB: loop body
LE: loop exit
PB: predicated region body
PF: predicated region fallthrough
CT: control target
= control target key end

     0   :  { %s588_s15 = smov [#allocation4]   ;;  %s740_s0 = inlined_call_operand.vmem [shape: s32[16], index: 0, kind: input, shape index: {}]   ;;  %s741_s1 = inlined_call_operand.hbm [shape: f32[32,128], index: 1, kind: input, shape index: {}]   ;;  %s742_s2 = inlined_call_operand.hbm [shape: f32[8,128], index: 2, kind: input, shape index: {}]   ;;  %s743_s3 = inlined_call_operand.hbm [shape: f32[2,8,128], index: 3, kind: output, shape index: {}]  }
   0x1   :  { %s9_s14 = sshll.u32 %s740_s0, 4  ;;  %s10_s14 = int_to_ptr.vmem [resolvable:$true] %s9_s14 }
   0x2   :  { %12 = dma.vmem_to_smem %s10_s14, 16, %s588_s15, [#allocation3] }
   0x3   :  { %546 = dma.done.wait [#allocation3], 16 }
   0x4   :  { %547 = vsyncadd [#allocation3], 4294967280 }
   0x5   :  { %15 = sfence }
   0x6   :  { %16 = vsyncpa [#allocation6], 0 }
   0x7   :  { %17 = vsyncpa [#allocation9], 0 }
   0x8   :  { %18 = vsyncpa [#allocation7], 0 }
   0x9   :  { %20 = vsyncpa [#allocation7 + $0x1], 0  ;;  %s616_s16 = smov 0   ;;  %s618_s17 = smov 0  }
   0xa   :  { %s620_s18 = smov 0   ;;  %s622_s19 = smov 0  }
   0xb   :  { %s624_s20 = smov 0   ;;  %s626_s0 = smov 0  }
   0xc LB: > { %s310_s21 = sadd.s32 4294967295, %s582_s0   ;;  %s311_s22 = sadd.s32 4294967294, %s582_s0   ;;  %s582_s0 = sphi %s626_s0, %s26_s0   ;;  %s578_s20 = sphi %s624_s20, %s752_s20   ;;  %s574_s19 = sphi %s622_s19, %s751_s19   ;;  %s570_s18 = sphi %s620_s18, %s750_s18   ;;  %s566_s17 = sphi %s618_s17, %s749_s17   ;;  %s562_s16 = sphi %s616_s16, %s748_s16  }
   0xd   : > { %s35_s23 = sadd.s32 1, %s578_s20  ;;  %s94_s24 = sadd.s32 1, %s570_s18 }
   0xe   : > { %p36_p0 = scmp.ge.s32.totalorder %s35_s23, 2  ;;  %p104_p1 = scmp.ne.s32.totalorder %s570_s18, %s566_s17 }
   0xf   : > { %p105_p2 = scmp.eq.s32.totalorder %s310_s21, 1  ;;  %p110_p3 = scmp.ne.s32.totalorder %s566_s17, %s562_s16 }
  0x10   : > { %s754_s23 = smov (%p36_p0, %s35_s23), 0  ;;  %p111_p5 = scmp.eq.s32.totalorder %s311_s22, 1 }
  0x11   : > { %p656_p4 = por %p105_p2, %p104_p1  ;;  %s89_s26 = ssub.s32 %s578_s20, %s754_s23 }
  0x12   : > { %p312_p6 = scmp.ge.s32.totalorder %s582_s0, 1  ;;  %p92_p7 = scmp.eq.s32.totalorder %s89_s26, 0 }
  0x13   : > { %p663_p8 = por %p111_p5, %p110_p3  ;;  %p118_p9 = scmp.lt.s32.totalorder %s582_s0, 3 }
  0x14   : > { %s669_s28 = scalar_select %p92_p7, %s570_s18, %s94_s24  }
  0x15   : > { %p671_p10 = pnand %p312_p6, %p118_p9  ;;  %p675_p11 = scmp.eq.s32.totalorder %s310_s21, 0 }
  0x16   : > { %s129_s6 = sshll.u32 %s741_s1, 4  ;;  %s589_s7 = smov [#allocation5]   ;;  %s130_s6 = int_to_ptr.hbm [resolvable:$true] %s129_s6 }
  0x17   : > { %p341_p12 = pneg %p671_p10  ;;  %s131_s8 = sshll.u32 %s589_s7, 4  ;;  %s132_s8 = int_to_ptr.vmem [resolvable:$true] %s131_s8 }
  0x18   : > { %s146_s11 = sshll.u32 %s742_s2, 4  ;;  %s590_s12 = smov 128   ;;  %s147_s11 = int_to_ptr.hbm [resolvable:$true] %s146_s11 }
  0x19   : > { %p342_p13 = pnand %p675_p11, %p341_p12  ;;  %s591_s13 = smov 8  }
  0x1a   : > { %s592_s14 = smov [#allocation8]   ;;  %161 = sbr.rel (%p671_p10) target bundleno = 63 (0x3f), region = 28 }
  0x1b   : > { %344 = dma.hbm_to_vmem [thread:$0]  (!%p342_p13), %s130_s6, 512, %s132_s8, [#allocation6], %s590_s12, %s590_s12, %s591_s13  }
  0x1c   : > { %s148_s15 = sshll.u32 %s592_s14, 4  ;;  %s149_s15 = int_to_ptr.vmem [resolvable:$true] %s148_s15 }
  0x1d   : > { %347 = dma.hbm_to_vmem [thread:$0]  (!%p342_p13), %s147_s11, 128, %s149_s15, [#allocation9]  }
  0x1f   : > { %549 = dma.done.wait (%p675_p11), [#allocation6], 512  }
  0x20   : > { %551 = vsyncadd (%p675_p11), [#allocation6], 4294966784 }
  0x21   : > { %553 = dma.done.wait (%p675_p11), [#allocation9], 128  }
  0x22   : > { %555 = vsyncadd (%p675_p11), [#allocation9], 4294967168  ;;  %s181_s21 = sand.u32 1, %s566_s17   ;;  %s319_s22 = sshll.u32 %s574_s19, 3 }
  0x23   : > { %s318_s24 = sshll.u32 %s181_s21, 3  ;;  %s584_s29 = smov 0  }
  0x24   : > { %s183_s26 = scalar_lea.vmem [#allocation10], %s318_s24 }
  0x25 LB: >> { %s192_s4 = sadd.s32 %s586_s29, %s319_s22  ;;  %s200_s6 = scalar_lea.vmem [#allocation2], %s586_s29  ;;  %s586_s29 = sphi %s584_s29, %s191_s29  }
  0x26   : >> { %s193_s5 = sld [smem:[#allocation4 + %s192_s4]]  ;;  %s191_s29 = sadd.s32 1, %s586_s29  }
  0x27   : >> { %p188_p2 = scmp.ge.s32.totalorder %s191_s29, 8  }
  0x28   : > { %v203_v2 = vld [vmem:[#allocation8] sm:$0xff] (%p188_p2)  ;;  %s218_s8 = scalar_lea.hbm (%p188_p2), %s743_s3, %s319_s22  ;;  %s220_s9 = sshll.u32 (%p188_p2), %s183_s26, 4  ;;  %s221_s9 = int_to_ptr.vmem [resolvable:$true] %s220_s9 }
  0x29   : > { %s222_s10 = sshll.u32 (%p188_p2), %s218_s8, 4  ;;  %s207_s11 = scalar_lea.sflag (%p188_p2), [#allocation7], %s181_s21  ;;  %s223_s10 = int_to_ptr.hbm [resolvable:$true] %s222_s10 }
  0x2a   : > { %s504_s12 = sshra.s32 (%p188_p2), %s223_s10, 4  ;;  %s510_s24 = scalar_lea.hbm (%p188_p2), %s743_s3, 16  ;;  %s505_s12 = int_to_ptr.hbm [resolvable:$true] %s504_s12 }
  0x2b   : > { %s506_s13 = scalar_lea.hbm (%p188_p2), %s505_s12, 8  ;;  %p511_p7 = scmp.lt.s32.totalorder (%p188_p2), %s505_s12, %s743_s3 }
  0x2c   : >> { %p194_p0 = scmp.gt.s32.totalorder %s193_s5, 0  ;;  %p320_p1 = scmp.lt.s32.totalorder %s193_s5, 31 }
  0x2d   : > { %p507_p3 = scmp.ne.s32.totalorder (%p188_p2), %s505_s12, %s506_s13  ;;  %p512_p9 = scmp.lt.s32.totalorder (%p188_p2), %s510_s24, %s506_s13 }
  0x2e   : >> { %s756_s5 = smov (!%p194_p0, %s193_s5), 0  ;;  %190 = sbr.rel (!%p188_p2) target bundleno = 37 (0x25), region = 79 }
  0x2f   : >> { %s758_s5 = smov (!%p320_p1, %s756_s5), 31  ;;  %p508_p5 = pnand (%p188_p2), %p507_p3, %p656_p4 }
  0x30   : >> { %s198_s30 = scalar_lea.vmem [#allocation5], %s758_s5  ;;  %p513_p10 = por (%p188_p2), %p512_p9, %p511_p7 }
  0x31   : >> { %v199_v0 = vld [vmem:[%s198_s30] sm:$0x1]  ;;  %p509_p6 = pneg (%p188_p2), %p508_p5 }
  0x32   : >> { %201 = vst [vmem:[%s200_s6] sm:$0x1] %v199_v0 }
  0x33   : > { %p514_p11 = pnand %p513_p10, %p509_p6 }
  0x39   : > { %v202_v1 = vld [vmem:[#allocation2] sm:$0xff] }
  0x3a   : > { %v204_v3 = vadd.f32 %v203_v2, %v202_v1 }
  0x3c   : > { %205 = vst [vmem:[%s183_s26] sm:$0xff] %v204_v3 }
  0x3d   : > { %517 = shalt.err (!%p514_p11)
}
  0x3e   : > { %339 = dma.vmem_to_hbm [thread:$0]  (%p656_p4), %s221_s9, 128, %s223_s10, %s207_s11  }
  0x3f PF: > { %p356_p12 = scmp.ge.s32.totalorder %s582_s0, 2  ;;  %s234_s21 = sand.u32 1, %s562_s16  }
  0x40   : > { %s235_s26 = scalar_lea.sflag [#allocation7], %s234_s21 }
  0x41   : > { %p349_p13 = pnand %p356_p12, %p663_p8 }
  0x43   : > { %p350_p0 = pneg %p349_p13 }
  0x45   : > { %557 = dma.done.wait (%p350_p0), %s235_s26, 128  }
  0x46   : > { %559 = vsyncadd (%p350_p0), %s235_s26, 4294967168  ;;  %s26_s0 = sadd.s32 1, %s582_s0   ;;  %s748_s16 = smov %s566_s17 }
  0x47   : > { %p23_p1 = scmp.ge.s32.totalorder %s26_s0, 4   ;;  %s749_s17 = smov %s570_s18 }
  0x48   : > { %s750_s18 = smov %s669_s28  ;;  %s751_s19 = smov %s578_s20 }
  0x49   : > { %s752_s20 = smov %s754_s23  ;;  %25 = sbr.rel (!%p23_p1) target bundleno = 12 (0xc), region = 90 }
  0x4e   :  { %241 = vsyncpa [#allocation6], 1 }
  0x4f   :  { %243 = vsyncpa [#allocation6 + $0x1], 1 }
  0x50   :  { %244 = vsyncpa [#allocation9], 1 }
  0x51   :  { %245 = vsyncpa [#allocation7], 1 }
  0x52   :  { %247 = vsyncpa [#allocation7 + $0x1], 1 }

</bundles_post_ra>
